<compile_context>
chip_gen: v6e
topology: v6e:2x2x1
jax: 0.10.0
libtpu: 0.0.40
codegen_flags: <defaults>
</compile_context>

<pallas_src>
import functools

import jax
import jax.numpy as jnp
from jax import lax
from jax.experimental import pallas as pl
from jax.experimental.pallas import tpu as pltpu

EPS = 1e-5  # nn.LayerNorm default eps


# --------------------------------------------------------------------------
# shared in-kernel helpers
# --------------------------------------------------------------------------
def _layernorm(x, w, b):
    mu = jnp.mean(x, axis=-1, keepdims=True)
    xc = x - mu
    var = jnp.mean(xc * xc, axis=-1, keepdims=True)
    return xc * lax.rsqrt(var + EPS) * w + b


def _dot_nt(a, b):
    """a @ b.T without materialising the transpose (MXU NT matmul)."""
    return lax.dot_general(a, b, (((1,), (1,)), ((), ())),
                           preferred_element_type=jnp.float32)


_ERF_P = 0.3275911
_ERF_A = (0.254829592, -0.284496736, 1.421413741, -1.453152027, 1.061405429)


def _gelu_exact(x):
    """erf-form GELU; erf via Abramowitz-Stegun 7.1.26 (|err| <= 1.5e-7)."""
    z = x * (2.0 ** -0.5)
    az = jnp.abs(z)
    t = 1.0 / (1.0 + _ERF_P * az)
    poly = t * (_ERF_A[0] + t * (_ERF_A[1] + t * (_ERF_A[2]
                + t * (_ERF_A[3] + t * _ERF_A[4]))))
    erf_abs = 1.0 - poly * jnp.exp(-az * az)
    erf = jnp.where(z >= 0, erf_abs, -erf_abs)
    return 0.5 * x * (1.0 + erf)


# --------------------------------------------------------------------------
# pltpu.roll direction probe (tiny kernel, run once, cached).  The mixer's
# lane butterfly / column shifts are direction-sensitive, so the wrapper
# verifies the hardware rotate convention instead of assuming it.
# --------------------------------------------------------------------------
_ROLL_LIKE_JNP = None


def _roll_like_jnp() -> bool:
    """True iff pltpu.roll(x, s, ax) == jnp.roll(x, s, ax) (out[j] = x[j-s])."""
    global _ROLL_LIKE_JNP
    if _ROLL_LIKE_JNP is None:
        def probe(x_ref, o_ref):
            o_ref[...] = pltpu.roll(x_ref[...], 1, 1)
        x = jnp.tile(jnp.arange(128, dtype=jnp.int32)[None, :], (8, 1))
        y = pl.pallas_call(
            probe, out_shape=jax.ShapeDtypeStruct((8, 128), jnp.int32))(x)
        _ROLL_LIKE_JNP = bool(int(y[0, 0]) == 127)
    return _ROLL_LIKE_JNP


# --------------------------------------------------------------------------
# Stage 1: x = x + DWConv7x7(LayerNorm1(x))   lane-dense (H, W*C) view
# --------------------------------------------------------------------------
def _mixer_kernel(x_ref, lnw_ref, lnb_ref, cw_ref, cb_ref, o_ref, *,
                  W, C, roll_jnp):
    H = x_ref.shape[1]
    WC = W * C
    x2 = x_ref[0]                                   # (H, W*C), lane-dense

    def rot_up(a, k):
        # out[:, j] = a[:, (j + k) % WC]   (cyclic lane rotation on the XLU)
        k = k % WC
        if k == 0:
            return a
        return pltpu.roll(a, WC - k if roll_jnp else k, axis=1)

    lane = lax.broadcasted_iota(jnp.int32, (1, WC), 1)

    def seg_sum(a):
        # Sum over each pixel's aligned C-lane channel group, broadcast back.
        # Hypercube butterfly: partner lane j ^ s stays inside the segment.
        out = a
        s = 1
        while s < C:
            up = rot_up(out, s)           # [:, j] = out[:, j + s]
            dn = rot_up(out, WC - s)      # [:, j] = out[:, j - s]
            out = out + jnp.where((lane & s) == 0, up, dn)
            s *= 2
        return out

    inv_c = 1.0 / C
    mean = seg_sum(x2) * inv_c
    xc = x2 - mean
    var = seg_sum(xc * xc) * inv_c
    ln = xc * lax.rsqrt(var + EPS) * lnw_ref[...] + lnb_ref[...]

    def shift_pixels(a, ox):
        # out[y, x*C + c] = a[y, (x + ox)*C + c], zero where x+ox leaves the row
        if ox == 0:
            return a
        s = ox * C
        r = rot_up(a, s % WC)
        if ox > 0:
            return jnp.where(lane < WC - s, r, 0.0)
        return jnp.where(lane >= -s, r, 0.0)

    def shift_rows(a, oy):
        # out[y] = a[y + oy], zero outside [0, H)
        if oy == 0:
            return a
        z = jnp.zeros((abs(oy), WC), a.dtype)
        if oy > 0:
            return jnp.concatenate([a[oy:], z], axis=0)
        return jnp.concatenate([z, a[:H + oy]], axis=0)

    # 7x7 depthwise conv (padding=3): dy outer / dx inner so at most ONE
    # lane-shifted copy of `ln` is live at a time (rolls are cheap XLU work).
    acc = None
    for dy in range(7):
        inner = None
        for dx in range(7):
            tap = cw_ref[dy * 7 + dx:dy * 7 + dx + 1, :]     # (1, W*C)
            contrib = shift_pixels(ln, dx - 3) * tap
            inner = contrib if inner is None else inner + contrib
        shifted = shift_rows(inner, dy - 3)
        acc = shifted if acc is None else acc + shifted

    o_ref[0] = (x_ref[0] + acc + cb_ref[...]).astype(o_ref.dtype)


def token_mixer(x_hwc, lnw_t, lnb_t, cw_t, cb_t, *, W, C):
    B, H, WC = x_hwc.shape
    kernel = functools.partial(_mixer_kernel, W=W, C=C,
                               roll_jnp=_roll_like_jnp())
    return pl.pallas_call(
        kernel,
        out_shape=jax.ShapeDtypeStruct((B, H, WC), x_hwc.dtype),
        grid=(B,),
        in_specs=[
            pl.BlockSpec((1, H, WC), lambda b: (b, 0, 0)),
            pl.BlockSpec((1, WC), lambda b: (0, 0)),
            pl.BlockSpec((1, WC), lambda b: (0, 0)),
            pl.BlockSpec((49, WC), lambda b: (0, 0)),
            pl.BlockSpec((1, WC), lambda b: (0, 0)),
        ],
        out_specs=pl.BlockSpec((1, H, WC), lambda b: (b, 0, 0)),
        compiler_params=pltpu.CompilerParams(dimension_semantics=("parallel",)),
    )(x_hwc, lnw_t, lnb_t, cw_t, cb_t)


# --------------------------------------------------------------------------
# Stage 2: norm2 + fused qkv + hard-coded 1588-split SDPA + proj + residual
# --------------------------------------------------------------------------
def _head_masks(C, num_heads):
    lane = lax.broadcasted_iota(jnp.int32, (1, C), 1)
    hd = C // num_heads
    return [(lane // hd == h).astype(jnp.float32) for h in range(num_heads)]


def _pack_heads(t, masks):
    """(rows, C) -> (num_heads*rows, C): rows h*rows+j = t[j] * head_mask[h]."""
    return jnp.concatenate([t * m for m in masks], axis=0)


def _packed_segment_softmax_pv(s, v_packed, seg):
    """Per-`seg`-column-segment softmax of packed scores, then @ packed values.

    s:        (R, nh*seg) packed scores (column h*seg+j = head h, key j)
    v_packed: (nh*seg, C) packed, head-masked values
    The per-row global max is a valid shift constant for every segment; the
    per-segment denominators come from one block-diagonal MXU matmul.
    """
    ncol = s.shape[-1]
    m = jnp.max(s, axis=-1, keepdims=True)
    e = jnp.exp(s - m)
    seg_i = lax.broadcasted_iota(jnp.int32, (ncol, ncol), 0) // seg
    seg_j = lax.broadcasted_iota(jnp.int32, (ncol, ncol), 1) // seg
    blk = (seg_i == seg_j).astype(jnp.float32)
    den = jnp.dot(e, blk, preferred_element_type=jnp.float32)
    p = e * pl.reciprocal(den, approx=True)
    return jnp.dot(p, v_packed, preferred_element_type=jnp.float32)


def _attn_img_kernel(x1_ref, x2_ref, lnw_ref, lnb_ref, wqkv_ref, bqkv_ref,
                     wo_ref, bo_ref, o_ref, *, num_heads):
    """Half-1 image queries (one TQ-row tile): attend to the trailing n2 KVs."""
    C = x1_ref.shape[-1]
    n2 = x2_ref.shape[1]
    scale = (C // num_heads) ** -0.5

    lnw, lnb = lnw_ref[...], lnb_ref[...]
    wqkv, bqkv = wqkv_ref[...], bqkv_ref[...]
    masks = _head_masks(C, num_heads)

    x1 = x1_ref[0]                                   # (TQ, C) query tile
    x2 = x2_ref[0]                                   # (n2, C) trailing tokens

    f1 = jnp.dot(_layernorm(x1, lnw, lnb), wqkv,
                 preferred_element_type=jnp.float32) + bqkv      # (TQ, 3C)
    f2 = jnp.dot(_layernorm(x2, lnw, lnb), wqkv,
                 preferred_element_type=jnp.float32) + bqkv      # (n2, 3C)

    # Heads packed along the key axis; the SDPA scale is folded into K2.
    k2 = _pack_heads(f2[:, C:2 * C] * scale, masks)              # (nh*n2, C)
    v2 = _pack_heads(f2[:, 2 * C:], masks)                       # (nh*n2, C)
    k2pad = jnp.concatenate(
        [k2, jnp.zeros((k2.shape[0], 2 * C), jnp.float32)], axis=1)

    s = _dot_nt(f1, k2pad)                                       # (TQ, nh*n2)
    attn = _packed_segment_softmax_pv(s, v2, n2)                 # (TQ, C)
    y = jnp.dot(attn, wo_ref[...],
                preferred_element_type=jnp.float32) + bo_ref[...]
    o_ref[0] = (x1 + y).astype(o_ref.dtype)


def _attn_edge_kernel(regs_ref, x1_ref, x2_ref, lnw_ref, lnb_ref,
                      wqkv_ref, bqkv_ref, wo_ref, bo_ref,
                      regs_out_ref, x2_out_ref, *, num_heads, chunk):
    """Register queries (half 1) + trailing-token queries (half 2, all keys)."""
    C = x2_ref.shape[-1]
    n1 = x1_ref.shape[1]
    n2 = x2_ref.shape[1]
    scale = (C // num_heads) ** -0.5

    lnw, lnb = lnw_ref[...], lnb_ref[...]
    wqkv, bqkv = wqkv_ref[...], bqkv_ref[...]
    wo, bo = wo_ref[...], bo_ref[...]
    masks = _head_masks(C, num_heads)

    regs = regs_ref[0]                               # (K, C)
    x2 = x2_ref[0]                                   # (n2, C)
    f_r = jnp.dot(_layernorm(regs, lnw, lnb), wqkv,
                  preferred_element_type=jnp.float32) + bqkv     # (K, 3C)
    f2 = jnp.dot(_layernorm(x2, lnw, lnb), wqkv,
                 preferred_element_type=jnp.float32) + bqkv      # (n2, 3C)

    # --- half 1, register queries: keys/values are the trailing n2 tokens
    k2 = _pack_heads(f2[:, C:2 * C] * scale, masks)
    v2 = _pack_heads(f2[:, 2 * C:], masks)
    k2pad = jnp.concatenate(
        [k2, jnp.zeros((k2.shape[0], 2 * C), jnp.float32)], axis=1)
    s_r = _dot_nt(f_r, k2pad)                                    # (K, nh*n2)
    attn_r = _packed_segment_softmax_pv(s_r, v2, n2)             # (K, C)
    regs_out_ref[0] = (regs + jnp.dot(attn_r, wo,
                       preferred_element_type=jnp.float32) + bo
                       ).astype(regs_out_ref.dtype)

    # --- half 2: trailing n2 queries attend to [registers ; first n1 tokens]
    q2 = _pack_heads(f2[:, :C] * scale, masks)                   # (nh*n2, C)
    zeros_c = jnp.zeros((q2.shape[0], C), jnp.float32)
    q2pad = jnp.concatenate([zeros_c, q2, zeros_c], axis=1)      # (nh*n2, 3C)

    # Chunked online softmax over the keys; acc accumulates p @ [q|k|v] so the
    # big fused activations are never lane-sliced (only the small (64, 3C)
    # accumulator is, once, at the end).
    s0 = _dot_nt(q2pad, f_r)                                     # (nh*n2, K)
    m = jnp.max(s0, axis=-1, keepdims=True)
    e0 = jnp.exp(s0 - m)
    l = jnp.sum(e0, axis=-1, keepdims=True)
    acc = jnp.dot(e0, f_r, preferred_element_type=jnp.float32)   # (nh*n2, 3C)

    for ci in range(n1 // chunk):
        xc = x1_ref[0, ci * chunk:(ci + 1) * chunk, :]
        fc = jnp.dot(_layernorm(xc, lnw, lnb), wqkv,
                     preferred_element_type=jnp.float32) + bqkv  # (chunk, 3C)
        sc = _dot_nt(q2pad, fc)                                  # (nh*n2, chunk)
        m_new = jnp.maximum(m, jnp.max(sc, axis=-1, keepdims=True))
        alpha = jnp.exp(m - m_new)
        ec = jnp.exp(sc - m_new)
        l = alpha * l + jnp.sum(ec, axis=-1, keepdims=True)
        acc = alpha * acc + jnp.dot(ec, fc, preferred_element_type=jnp.float32)
        m = m_new

    out3c = acc * pl.reciprocal(l, approx=True)                  # (nh*n2, 3C)
    v_attn = out3c[:, 2 * C:]                                    # (nh*n2, C)
    attn_x2 = None
    for h in range(num_heads):
        part = v_attn[h * n2:(h + 1) * n2, :] * masks[h]
        attn_x2 = part if attn_x2 is None else attn_x2 + part
    x2_out_ref[0] = (x2 + jnp.dot(attn_x2, wo,
                     preferred_element_type=jnp.float32) + bo
                     ).astype(x2_out_ref.dtype)


def attn_image_queries(x1, x2, params, *, num_heads, tile_q):
    B, n1, C = x1.shape
    n2 = x2.shape[1]
    kernel = functools.partial(_attn_img_kernel, num_heads=num_heads)
    return pl.pallas_call(
        kernel,
        out_shape=jax.ShapeDtypeStruct((B, n1, C), x1.dtype),
        grid=(B, n1 // tile_q),
        in_specs=[
            pl.BlockSpec((1, tile_q, C), lambda b, t: (b, t, 0)),
            pl.BlockSpec((1, n2, C), lambda b, t: (b, 0, 0)),
            pl.BlockSpec((1, C), lambda b, t: (0, 0)),
            pl.BlockSpec((1, C), lambda b, t: (0, 0)),
            pl.BlockSpec((C, 3 * C), lambda b, t: (0, 0)),
            pl.BlockSpec((1, 3 * C), lambda b, t: (0, 0)),
            pl.BlockSpec((C, C), lambda b, t: (0, 0)),
            pl.BlockSpec((1, C), lambda b, t: (0, 0)),
        ],
        out_specs=pl.BlockSpec((1, tile_q, C), lambda b, t: (b, t, 0)),
        compiler_params=pltpu.CompilerParams(
            dimension_semantics=("parallel", "parallel")),
    )(x1, x2, params["ln2_w"], params["ln2_b"], params["qkv_w"],
      params["qkv_b"], params["proj_w"], params["proj_b"])


def attn_edge_queries(registers, x1, x2, params, *, num_heads, chunk):
    B, K, C = registers.shape
    n1 = x1.shape[1]
    n2 = x2.shape[1]
    kernel = functools.partial(_attn_edge_kernel, num_heads=num_heads,
                               chunk=chunk)
    return pl.pallas_call(
        kernel,
        out_shape=(jax.ShapeDtypeStruct((B, K, C), registers.dtype),
                   jax.ShapeDtypeStruct((B, n2, C), x2.dtype)),
        grid=(B,),
        in_specs=[
            pl.BlockSpec((1, K, C), lambda b: (b, 0, 0)),
            pl.BlockSpec((1, n1, C), lambda b: (b, 0, 0)),
            pl.BlockSpec((1, n2, C), lambda b: (b, 0, 0)),
            pl.BlockSpec((1, C), lambda b: (0, 0)),
            pl.BlockSpec((1, C), lambda b: (0, 0)),
            pl.BlockSpec((C, 3 * C), lambda b: (0, 0)),
            pl.BlockSpec((1, 3 * C), lambda b: (0, 0)),
            pl.BlockSpec((C, C), lambda b: (0, 0)),
            pl.BlockSpec((1, C), lambda b: (0, 0)),
        ],
        out_specs=(pl.BlockSpec((1, K, C), lambda b: (b, 0, 0)),
                   pl.BlockSpec((1, n2, C), lambda b: (b, 0, 0))),
        compiler_params=pltpu.CompilerParams(dimension_semantics=("parallel",)),
    )(registers, x1, x2, params["ln2_w"], params["ln2_b"], params["qkv_w"],
      params["qkv_b"], params["proj_w"], params["proj_b"])


# --------------------------------------------------------------------------
# Stage 3: x = x + MLP(LayerNorm3(x))   sequence-tiled, fully pipelined
# --------------------------------------------------------------------------
def _mlp_kernel(x_ref, lnw_ref, lnb_ref, w1_ref, b1_ref, w2_ref, b2_ref, o_ref):
    x = x_ref[0]
    ln = _layernorm(x, lnw_ref[...], lnb_ref[...])
    h = jnp.dot(ln, w1_ref[...], preferred_element_type=jnp.float32) + b1_ref[...]
    h = _gelu_exact(h)                               # nn.GELU() exact (erf) form
    y = jnp.dot(h, w2_ref[...], preferred_element_type=jnp.float32) + b2_ref[...]
    o_ref[0] = (x + y).astype(o_ref.dtype)


def mlp_residual(x, ln_w, ln_b, w1, b1, w2, b2, *, tile_n):
    B, N, C = x.shape
    hid = w1.shape[1]
    return pl.pallas_call(
        _mlp_kernel,
        out_shape=jax.ShapeDtypeStruct((B, N, C), x.dtype),
        grid=(B, N // tile_n),
        in_specs=[
            pl.BlockSpec((1, tile_n, C), lambda b, t: (b, t, 0)),
            pl.BlockSpec((1, C), lambda b, t: (0, 0)),
            pl.BlockSpec((1, C), lambda b, t: (0, 0)),
            pl.BlockSpec((C, hid), lambda b, t: (0, 0)),
            pl.BlockSpec((1, hid), lambda b, t: (0, 0)),
            pl.BlockSpec((hid, C), lambda b, t: (0, 0)),
            pl.BlockSpec((1, C), lambda b, t: (0, 0)),
        ],
        out_specs=pl.BlockSpec((1, tile_n, C), lambda b, t: (b, t, 0)),
        compiler_params=pltpu.CompilerParams(
            dimension_semantics=("parallel", "parallel")),
    )(x, ln_w, ln_b, w1, b1, w2, b2)


def _pick_tile(n, cap):
    top = min(cap, n)
    top -= top % 8
    for t in range(top, 7, -8):
        if n % t == 0:
            return t
    return n


# --------------------------------------------------------------------------
# Full block forward (mirrors MaskedRegisterAttentionBlock.forward, eval mode)
# --------------------------------------------------------------------------
def masked_register_attention_block(x, registers, params, *, num_heads,
                                    attn_split=1588):
    B, C, H, W = x.shape
    K = registers.shape[1]
    N = H * W
    S = K + N
    n1 = attn_split - K          # image tokens inside the leading (query) group
    n2 = S - attn_split          # trailing image tokens (KV of half 1)
    assert C % num_heads == 0
    assert (C & (C - 1)) == 0 and C <= 128, "mixer LN uses a pow2 lane butterfly"
    assert (W * C) % 128 == 0, "lane-dense mixer rows must be 128-lane multiples"
    assert 0 < n1 < N and n2 > 0, (K, attn_split, S)
    assert n1 % 8 == 0, "leading image-token count must be sublane aligned"

    # stage 1: x = x + token_mixer(norm1(x)) on a lane-dense (B, H, W*C) view
    x_hwc = jnp.transpose(x, (0, 2, 3, 1)).reshape(B, H, W * C)
    lnw_t = jnp.tile(params["ln1_w"], (1, W))
    lnb_t = jnp.tile(params["ln1_b"], (1, W))
    cb_t = jnp.tile(params["conv_b"], (1, W))
    cw_t = jnp.tile(params["conv_w"].reshape(7, 7, 1, C),
                    (1, 1, W, 1)).reshape(49, W * C)
    x_hwc = token_mixer(x_hwc, lnw_t, lnb_t, cw_t, cb_t, W=W, C=C)
    xs = x_hwc.reshape(B, N, C)

    # stage 2: norm2 + fused qkv + hard-coded cross-split SDPA + proj + residual
    x1 = xs[:, :n1]
    x2 = xs[:, n1:]
    tile_q = _pick_tile(n1, 320)
    x1_out = attn_image_queries(x1, x2, params, num_heads=num_heads,
                                tile_q=tile_q)
    regs_out, x2_out = attn_edge_queries(registers, x1, x2, params,
                                         num_heads=num_heads, chunk=tile_q)
    xs = jnp.concatenate([x1_out, x2_out], axis=1)

    # stage 3: x = x + mlp(norm3(x)) over image tokens only (registers bypass)
    xs = mlp_residual(xs, params["ln3_w"], params["ln3_b"],
                      params["fc1_w"], params["fc1_b"],
                      params["fc2_w"], params["fc2_b"],
                      tile_n=_pick_tile(N, 800))

    x_out = jnp.transpose(xs.reshape(B, H, W, C), (0, 3, 1, 2))
    return x_out, regs_out


# --------------------------------------------------------------------------
# Pure-JAX reference (mirrors the PyTorch module) for numerical validation
# --------------------------------------------------------------------------
def _reference_forward(x, registers, params, *, num_heads, attn_split=1588):
    B, C, H, W = x.shape
    K = registers.shape[1]
    N = H * W

    def ln(z, w, b):
        mu = jnp.mean(z, axis=-1, keepdims=True)
        var = jnp.mean((z - mu) ** 2, axis=-1, keepdims=True)
        return (z - mu) / jnp.sqrt(var + EPS) * w + b

    xs = x.reshape(B, C, N).transpose(0, 2, 1)                    # (B, N, C)

    z = ln(xs, params["ln1_w"], params["ln1_b"])
    zim = z.transpose(0, 2, 1).reshape(B, C, H, W)
    wk = params["conv_w"].transpose(2, 0, 1)[:, None]             # (C,1,7,7)
    conv = lax.conv_general_dilated(
        zim, wk, (1, 1), ((3, 3), (3, 3)),
        dimension_numbers=("NCHW", "OIHW", "NCHW"), feature_group_count=C)
    conv = conv + params["conv_b"].reshape(1, C, 1, 1)
    xs = xs + conv.reshape(B, C, N).transpose(0, 2, 1)

    seq = jnp.concatenate([registers, xs], axis=1)                # (B, S, C)
    z = ln(seq, params["ln2_w"], params["ln2_b"])
    qkv = z @ params["qkv_w"] + params["qkv_b"]
    q, k, v = jnp.split(qkv, 3, axis=-1)
    hd = C // num_heads

    def heads(t):
        return t.reshape(B, -1, num_heads, hd).transpose(0, 2, 1, 3)

    q, k, v = heads(q), heads(k), heads(v)

    def sdpa(q_, k_, v_):
        s = jnp.einsum("bhqd,bhkd->bhqk", q_, k_) * (hd ** -0.5)
        p = jax.nn.softmax(s, axis=-1)
        return jnp.einsum("bhqk,bhkd->bhqd", p, v_)

    sp = attn_split
    o = jnp.concatenate([sdpa(q[:, :, :sp], k[:, :, sp:], v[:, :, sp:]),
                         sdpa(q[:, :, sp:], k[:, :, :sp], v[:, :, :sp])],
                        axis=2)
    o = o.transpose(0, 2, 1, 3).reshape(B, -1, C)
    seq = seq + (o @ params["proj_w"] + params["proj_b"])

    regs_out = seq[:, :K]
    xs = seq[:, K:]
    z = ln(xs, params["ln3_w"], params["ln3_b"])
    h1 = jax.nn.gelu(z @ params["fc1_w"] + params["fc1_b"], approximate=False)
    xs = xs + (h1 @ params["fc2_w"] + params["fc2_b"])
    x_out = xs.transpose(0, 2, 1).reshape(B, C, H, W)
    return x_out, regs_out


if __name__ == "__main__":
    # Smallest shapes consistent with the module: MaskingAttention hard-codes a
    # 1588 split, so K + H*W must exceed 1588.  B=2, dim=32, heads=4, H=W=40
    # gives 1600 image tokens + 4 registers = 1604.
    B, C, H, W = 2, 32, 40, 40
    K, num_heads = 4, 4
    hidden = int(C * 4.0)

    key = jax.random.PRNGKey(0)
    keys = jax.random.split(key, 16)
    x = jax.random.normal(keys[0], (B, C, H, W), jnp.float32)
    registers = jax.random.normal(keys[1], (B, K, C), jnp.float32)

    # Deterministic synthetic parameters (torch Linear/Conv weights stored
    # pre-transposed to the layouts the kernels consume).
    params = dict(
        ln1_w=jnp.ones((1, C), jnp.float32), ln1_b=jnp.zeros((1, C), jnp.float32),
        conv_w=0.05 * jax.random.normal(keys[2], (7, 7, C), jnp.float32),
        conv_b=0.05 * jax.random.normal(keys[3], (1, C), jnp.float32),
        ln2_w=jnp.ones((1, C), jnp.float32), ln2_b=jnp.zeros((1, C), jnp.float32),
        qkv_w=0.05 * jax.random.normal(keys[4], (C, 3 * C), jnp.float32),
        qkv_b=0.05 * jax.random.normal(keys[5], (1, 3 * C), jnp.float32),
        proj_w=0.05 * jax.random.normal(keys[6], (C, C), jnp.float32),
        proj_b=0.05 * jax.random.normal(keys[7], (1, C), jnp.float32),
        ln3_w=jnp.ones((1, C), jnp.float32), ln3_b=jnp.zeros((1, C), jnp.float32),
        fc1_w=0.05 * jax.random.normal(keys[8], (C, hidden), jnp.float32),
        fc1_b=0.05 * jax.random.normal(keys[9], (1, hidden), jnp.float32),
        fc2_w=0.05 * jax.random.normal(keys[10], (hidden, C), jnp.float32),
        fc2_b=0.05 * jax.random.normal(keys[11], (1, C), jnp.float32),
    )

    _roll_like_jnp()   # resolve the hardware rotate convention before jitting

    fwd = jax.jit(functools.partial(masked_register_attention_block,
                                    num_heads=num_heads))
    x_out, regs_out = fwd(x, registers, params)
    jax.block_until_ready((x_out, regs_out))
    assert x_out.shape == (B, C, H, W), x_out.shape
    assert regs_out.shape == (B, K, C), regs_out.shape
    assert bool(jnp.all(jnp.isfinite(x_out)))
    assert bool(jnp.all(jnp.isfinite(regs_out)))

    # Numerical validation against a pure-JAX reference of the PyTorch module.
    x_ref, regs_ref = _reference_forward(x, registers, params,
                                         num_heads=num_heads)
    err_x = float(jnp.max(jnp.abs(x_out - x_ref)))
    err_r = float(jnp.max(jnp.abs(regs_out - regs_ref)))
    assert err_x < 1e-2 and err_r < 1e-2, (err_x, err_r)

    print("KERNEL_OK")
</pallas_src>

<mosaic_0001>
module attributes {stable_mosaic.version = 11 : i64} {
  func.func @probe(%arg0: memref<8x128xi32, #tpu.memory_space<vmem>>, %arg1: memref<8x128xi32, #tpu.memory_space<vmem>>) attributes {dimension_semantics = [], scalar_prefetch = 0 : i64, scratch_operands = 0 : i64, tpu.core_type = #tpu.core_type<tc>} {
    %c0 = arith.constant 0 : index
    %c0_0 = arith.constant 0 : index
    %0 = vector.load %arg0[%c0, %c0_0] : memref<8x128xi32, #tpu.memory_space<vmem>>, vector<8x128xi32>
    %c1_i32 = arith.constant 1 : i32
    %1 = tpu.dynamic_rotate %0 by %c1_i32 dim 1 : vector<8x128xi32>, i32 -> vector<8x128xi32>
    %c0_1 = arith.constant 0 : index
    %c0_2 = arith.constant 0 : index
    %2 = vector.load %arg1[%c0_1, %c0_2] : memref<8x128xi32, #tpu.memory_space<vmem>>, vector<8x128xi32>
    tpu.vector_store %arg1[%c0_1, %c0_2], %1 {strides = array<i32>} : memref<8x128xi32, #tpu.memory_space<vmem>>, vector<8x128xi32>,
    return
  }
}

</mosaic_0001>

<bundles_post_ra>
// kernel: tpu_custom_call.1
= control target key start
LH: loop header
LB: loop body
LE: loop exit
PB: predicated region body
PF: predicated region fallthrough
CT: control target
= control target key end

     0   :  { %6 = vsyncpa [#allocation3], 0  ;;  %s106_s0 = inlined_call_operand.hbm [shape: s32[8,128], index: 0, kind: input, shape index: {}]   ;;  %s107_s1 = inlined_call_operand.hbm [shape: s32[8,128], index: 1, kind: output, shape index: {}]  }
   0x1   :  { %7 = vsyncpa [#allocation4], 0  ;;  %s87_s6 = smov [#allocation2]  }
   0x2   :  { %s14_s7 = sshll.u32 %s87_s6, 4  ;;  %s15_s7 = int_to_ptr.vmem [resolvable:$true] %s14_s7 }
   0x3   :  { %s51_s8 = scalar_lea.vmem %s15_s7, 128  ;;  %p56_p1 = scmp.lt.s32.totalorder %s15_s7, %s15_s7 }
   0x4   :  { %p52_p0 = scmp.ne.s32.totalorder %s15_s7, %s51_s8  ;;  %p57_p2 = scmp.lt.s32.totalorder %s51_s8, %s51_s8 }
   0x6   :  { %p58_p3 = por %p57_p2, %p56_p1 }
   0x8   :  { %p59_p4 = pnand %p58_p3, %p52_p0 }
   0xa   :  { %62 = shalt.err (!%p59_p4)
}
   0xb   :  { %17 = dma.hbm_to_vmem [thread:$0]  %s106_s0, 128, %s15_s7, [#allocation3]  }
   0xc   :  { %83 = dma.done.wait [#allocation3], 128  }
   0xd   :  { %84 = vsyncadd [#allocation3], 4294967168  ;;  %v21_v0 = vld [vmem:[#allocation2] sm:$0xff]  ;;  %s88_s11 = smov 1   ;;  %s89_s12 = smov [#allocation5]  }
   0xe   :  { %22 = vrot.lane.b32.xlu0 %v21_v0, %s88_s11  ;;  %s31_s13 = sshll.u32 %s89_s12, 4  ;;  %s32_s13 = int_to_ptr.vmem [resolvable:$true] %s31_s13 }
   0xf   :  { %s63_s14 = scalar_lea.vmem %s32_s13, 128  ;;  %p68_p6 = scmp.lt.s32.totalorder %s32_s13, %s32_s13 }
  0x10   :  { %p64_p5 = scmp.ne.s32.totalorder %s32_s13, %s63_s14  ;;  %p69_p7 = scmp.lt.s32.totalorder %s63_s14, %s63_s14 }
  0x12   :  { %p70_p8 = por %p69_p7, %p68_p6 }
  0x14   :  { %p71_p9 = pnand %p70_p8, %p64_p5 }
  0x80   :  { %v23_v1 = vpop.permute.xlu0 %22 }
  0x81   :  { %24 = vst [vmem:[#allocation5] sm:$0xff] %v23_v1 }
  0x82   :  { %74 = shalt.err (!%p71_p9)
}
  0x83   :  { %34 = dma.vmem_to_hbm [thread:$0]  %s32_s13, 128, %s107_s1, [#allocation4]  }
  0x84   :  { %85 = dma.done.wait [#allocation4], 128  }
  0x85   :  { %86 = vsyncadd [#allocation4], 4294967168 }
  0x86   :  { %38 = vsyncpa [#allocation3], 1 }
  0x87   :  { %39 = vsyncpa [#allocation4], 1 }

</bundles_post_ra>
